<compile_context>
chip_gen: v5e
topology: v5e:2x2
jax: 0.10.0
libtpu: 0.0.40
codegen_flags: <defaults>
</compile_context>

<pallas_src>
import jax
import jax.numpy as jnp
from jax.experimental import pallas as pl
from jax.experimental.pallas import tpu as pltpu


def critic_kernel(x_ref, w1_ref, b1_ref, w2_ref, b2_ref, out_ref):
    # Hidden layer on the MXU: (TBr, fold*S) @ (fold*S, fold*H) -> (TBr, fold*H).
    h = jnp.dot(x_ref[...], w1_ref[...], preferred_element_type=jnp.float32)
    # Bias add (VPU) + tanh (EUP) on fully lane-dense vregs.
    h = jnp.tanh(h + b1_ref[...])
    # Value head: block-diagonal (fold*H, fold) matmul -> (TBr, fold); output
    # column g reduces the H hidden units belonging to folded batch row g.
    v = jnp.dot(h, w2_ref[...], preferred_element_type=jnp.float32)
    out_ref[...] = (v + b2_ref[0, 0]).astype(out_ref.dtype)


def _fold_params(w1, b1, w2, fold):
    """Build block-diagonal / tiled parameters for the lane-folded layout."""
    S, H = w1.shape
    if fold == 1:
        return w1, b1.reshape(1, H), w2.reshape(H, 1)
    eye = jnp.eye(fold, dtype=w1.dtype)
    # w1_blk[f*S + s, g*H + h] = w1[s, h] if f == g else 0
    w1_blk = (eye[:, None, :, None] * w1[None, :, None, :]).reshape(fold * S, fold * H)
    # b1 tiled across the fold groups: index g*H + h -> b1[h]
    b1_t = jnp.tile(b1.reshape(1, H), (1, fold))
    # w2_blk[f*H + h, g] = w2[h] if f == g else 0
    w2_blk = (eye[:, None, :] * w2.reshape(1, H, 1)).reshape(fold * H, fold)
    return w1_blk, b1_t, w2_blk


def critic_forward(state, w1, b1, w2, b2, *, tile_rows=128):
    """state: [B, state_dim] f32 -> value: [B, 1] f32.

    w1: [state_dim, H], b1: [1, H], w2: [H, 1], b2: [1, 1]
    (weights stored transposed relative to torch's nn.Linear (out, in)).
    """
    B, S = state.shape
    H = w1.shape[1]

    # Fold factor: pack `fold` batch rows into one lane-dense 128-wide row.
    fold = 128 // S if (S <= 128 and 128 % S == 0) else 1

    # Pad batch to a multiple of the fold factor (padding sliced off at the end;
    # every output row depends only on its own input row, so padding is safe).
    B_pad = ((B + fold - 1) // fold) * fold
    if B_pad != B:
        state = jnp.pad(state, ((0, B_pad - B), (0, 0)))
    Br = B_pad // fold
    x = state.reshape(Br, fold * S)          # free: batch rows are contiguous

    w1_blk, b1_t, w2_blk = _fold_params(w1, b1, w2, fold)
    b2 = jnp.asarray(b2, jnp.float32).reshape(1, 1)

    # Batch tile in folded rows. 128 folded rows == 1024 original rows:
    # per-step VMEM well under 1 MiB; B=8192 -> 8 grid steps (>=2 per TC on v7x).
    TBr = min(Br, tile_rows)
    grid = (pl.cdiv(Br, TBr),)

    out = pl.pallas_call(
        critic_kernel,
        out_shape=jax.ShapeDtypeStruct((Br, fold), jnp.float32),
        grid_spec=pltpu.PrefetchScalarGridSpec(
            num_scalar_prefetch=0,
            grid=grid,
            in_specs=[
                # folded state: tiled along batch, double-buffered by the pipeline.
                pl.BlockSpec((TBr, fold * S), lambda i: (i, 0)),
                # weights/biases: constant block index -> VMEM-resident, no re-DMA.
                pl.BlockSpec((fold * S, fold * H), lambda i: (0, 0)),
                pl.BlockSpec((1, fold * H), lambda i: (0, 0)),
                pl.BlockSpec((fold * H, fold), lambda i: (0, 0)),
                # b2: 4-byte scalar, keep it in SMEM.
                pl.BlockSpec(memory_space=pltpu.MemorySpace.SMEM),
            ],
            out_specs=pl.BlockSpec((TBr, fold), lambda i: (i, 0)),
        ),
        compiler_params=pltpu.CompilerParams(
            # Batch tiles are independent -> shard across TensorCores (v7x).
            dimension_semantics=("parallel",),
        ),
    )(x, w1_blk, b1_t, w2_blk, b2)

    # (Br, fold) row-major matches original batch order -> free reshape; drop pad.
    return out.reshape(B_pad, 1)[:B]


def init_critic_params(key, state_dim, nn_width):
    """Deterministic synthetic init (torch-Linear-like uniform fan-in bounds)."""
    k1, k2, k3, k4 = jax.random.split(key, 4)
    lim1 = 1.0 / jnp.sqrt(state_dim)
    lim2 = 1.0 / jnp.sqrt(nn_width)
    w1 = jax.random.uniform(k1, (state_dim, nn_width), jnp.float32, -lim1, lim1)
    b1 = jax.random.uniform(k2, (1, nn_width), jnp.float32, -lim1, lim1)
    w2 = jax.random.uniform(k3, (nn_width, 1), jnp.float32, -lim2, lim2)
    b2 = jax.random.uniform(k4, (1, 1), jnp.float32, -lim2, lim2)
    return w1, b1, w2, b2


def _reference(state, w1, b1, w2, b2):
    return jnp.tanh(state @ w1 + b1) @ w2 + b2


if __name__ == "__main__":
    key = jax.random.PRNGKey(0)
    state_dim, nn_width = 16, 32
    k_params, k_small, k_ragged, k_big = jax.random.split(key, 4)
    w1, b1, w2, b2 = init_critic_params(k_params, state_dim, nn_width)

    fwd = jax.jit(critic_forward)

    # Small case (single PPO rollout-step shape). Pure fixed overhead at this
    # size; callers should batch environments/timesteps (exercised below).
    state = jax.random.normal(k_small, (8, state_dim), jnp.float32)
    value = jax.block_until_ready(fwd(state, w1, b1, w2, b2))
    assert value.shape == (8, 1)
    assert jnp.allclose(value, _reference(state, w1, b1, w2, b2), atol=1e-5, rtol=1e-5)

    # Ragged batch (not a multiple of the fold factor): exercises padding path.
    state_r = jax.random.normal(k_ragged, (37, state_dim), jnp.float32)
    value_r = jax.block_until_ready(fwd(state_r, w1, b1, w2, b2))
    assert value_r.shape == (37, 1)
    assert jnp.allclose(value_r, _reference(state_r, w1, b1, w2, b2), atol=1e-5, rtol=1e-5)

    # Large batched case: exercises batch tiling (grid=8), resident weights and
    # the parallel grid axis (two TCs x >=2 steps each on v7x).
    state_b = jax.random.normal(k_big, (8192, state_dim), jnp.float32)
    value_b = jax.block_until_ready(fwd(state_b, w1, b1, w2, b2))
    assert value_b.shape == (8192, 1)
    assert jnp.allclose(value_b, _reference(state_b, w1, b1, w2, b2), atol=1e-5, rtol=1e-5)

    print("KERNEL_OK")
</pallas_src>

<mosaic_0001>
module attributes {stable_mosaic.version = 11 : i64} {
  func.func @critic_kernel(%arg0: i32, %arg1: memref<1x128xf32, #tpu.memory_space<vmem>>, %arg2: memref<128x256xf32, #tpu.memory_space<vmem>>, %arg3: memref<1x256xf32, #tpu.memory_space<vmem>>, %arg4: memref<256x8xf32, #tpu.memory_space<vmem>>, %arg5: memref<1x1xf32, #tpu.memory_space<smem>>, %arg6: memref<1x8xf32, #tpu.memory_space<vmem>>) attributes {dimension_semantics = [#tpu.dimension_semantics<parallel>], iteration_bounds = array<i64: 1>, scalar_prefetch = 0 : i64, scratch_operands = 0 : i64, tpu.core_type = #tpu.core_type<tc>, window_params = [{transform_indices = @transform_0, window_bounds = array<i64: 1, 128>}, {pipeline_mode = #tpu.pipeline_mode<synchronous>, transform_indices = @transform_1, window_bounds = array<i64: 128, 256>}, {pipeline_mode = #tpu.pipeline_mode<synchronous>, transform_indices = @transform_2, window_bounds = array<i64: 1, 256>}, {pipeline_mode = #tpu.pipeline_mode<synchronous>, transform_indices = @transform_3, window_bounds = array<i64: 256, 8>}, {transform_indices = @transform_4, window_bounds = array<i64: 1, 1>}, {transform_indices = @transform_5, window_bounds = array<i64: 1, 8>}]} {
    %c0 = arith.constant 0 : index
    %c0_0 = arith.constant 0 : index
    %0 = vector.load %arg1[%c0, %c0_0] : memref<1x128xf32, #tpu.memory_space<vmem>>, vector<1x128xf32>
    %c0_1 = arith.constant 0 : index
    %c0_2 = arith.constant 0 : index
    %1 = vector.load %arg2[%c0_1, %c0_2] : memref<128x256xf32, #tpu.memory_space<vmem>>, vector<128x256xf32>
    %cst = arith.constant dense<0.000000e+00> : vector<1x256xf32>
    %2 = tpu.matmul %0, %1, %cst {dimension_numbers = #tpu.dot_dimension_numbers<[1], [0], [0], [1], [0, 0, 1, 1], [], []>} : vector<1x128xf32>, vector<128x256xf32>, vector<1x256xf32> -> vector<1x256xf32>
    %c0_3 = arith.constant 0 : index
    %c0_4 = arith.constant 0 : index
    %3 = vector.load %arg3[%c0_3, %c0_4] : memref<1x256xf32, #tpu.memory_space<vmem>>, vector<1x256xf32>
    %4 = arith.addf %2, %3 : vector<1x256xf32>
    %5 = math.tanh %4 : vector<1x256xf32>
    %c0_5 = arith.constant 0 : index
    %c0_6 = arith.constant 0 : index
    %6 = vector.load %arg4[%c0_5, %c0_6] : memref<256x8xf32, #tpu.memory_space<vmem>>, vector<256x8xf32>
    %cst_7 = arith.constant dense<0.000000e+00> : vector<1x8xf32>
    %7 = tpu.matmul %5, %6, %cst_7 {dimension_numbers = #tpu.dot_dimension_numbers<[1], [0], [0], [1], [0, 0, 1, 1], [], []>} : vector<1x256xf32>, vector<256x8xf32>, vector<1x8xf32> -> vector<1x8xf32>
    %c0_8 = arith.constant 0 : index
    %c0_9 = arith.constant 0 : index
    %8 = memref.load %arg5[%c0_8, %c0_9] : memref<1x1xf32, #tpu.memory_space<smem>>
    %9 = vector.broadcast %8 : f32 to vector<1x8xf32>
    %10 = arith.addf %7, %9 : vector<1x8xf32>
    %c0_10 = arith.constant 0 : index
    %c0_11 = arith.constant 0 : index
    %11 = vector.load %arg6[%c0_10, %c0_11] : memref<1x8xf32, #tpu.memory_space<vmem>>, vector<1x8xf32>
    tpu.vector_store %arg6[%c0_10, %c0_11], %10 {strides = array<i32>} : memref<1x8xf32, #tpu.memory_space<vmem>>, vector<1x8xf32>,
    return
  }
  func.func @transform_0(%arg0: i32) -> (i32, i32) {
    %c0_i32 = arith.constant 0 : i32
    %c0_i32_0 = arith.constant 0 : i32
    return %arg0, %c0_i32 : i32, i32
  }
  func.func @transform_1(%arg0: i32) -> (i32, i32) {
    %c0_i32 = arith.constant 0 : i32
    %c0_i32_0 = arith.constant 0 : i32
    %c0_i32_1 = arith.constant 0 : i32
    return %c0_i32, %c0_i32_0 : i32, i32
  }
  func.func @transform_2(%arg0: i32) -> (i32, i32) {
    %c0_i32 = arith.constant 0 : i32
    %c0_i32_0 = arith.constant 0 : i32
    %c0_i32_1 = arith.constant 0 : i32
    return %c0_i32, %c0_i32_0 : i32, i32
  }
  func.func @transform_3(%arg0: i32) -> (i32, i32) {
    %c0_i32 = arith.constant 0 : i32
    %c0_i32_0 = arith.constant 0 : i32
    %c0_i32_1 = arith.constant 0 : i32
    return %c0_i32, %c0_i32_0 : i32, i32
  }
  func.func @transform_4(%arg0: i32) -> (i32, i32) {
    %c0_i32 = arith.constant 0 : i32
    %c0_i32_0 = arith.constant 0 : i32
    %c0_i32_1 = arith.constant 0 : i32
    return %c0_i32, %c0_i32_0 : i32, i32
  }
  func.func @transform_5(%arg0: i32) -> (i32, i32) {
    %c0_i32 = arith.constant 0 : i32
    %c0_i32_0 = arith.constant 0 : i32
    return %arg0, %c0_i32 : i32, i32
  }
}

</mosaic_0001>

<bundles_post_ra>
// kernel: critic_forward.1
= control target key start
LH: loop header
LB: loop body
LE: loop exit
PB: predicated region body
PF: predicated region fallthrough
CT: control target
= control target key end

     0   :  { %s461_s0 = inlined_call_operand.vmem [shape: f32[1,128], index: 0, kind: input, shape index: {}]   ;;  %s462_s1 = inlined_call_operand.vmem [shape: f32[128,256], index: 1, kind: input, shape index: {}]   ;;  %s463_s2 = inlined_call_operand.vmem [shape: f32[1,256], index: 2, kind: input, shape index: {}]   ;;  %s464_s3 = inlined_call_operand.vmem [shape: f32[256,8], index: 3, kind: input, shape index: {}]   ;;  %s465_s4 = inlined_call_operand.<no memory space> [shape: f32[1,1], index: 4, kind: input, shape index: {}]   ;;  %s466_s5 = inlined_call_operand.hbm [shape: f32[1,8], index: 5, kind: output, shape index: {}]  }
   0x1   :  { %v53_v0 = vld [vmem:[%s462_s1 + $0xf0] sm:$0xff]  ;;  %v51_v1 = vld [vmem:[%s462_s1 + $0xe0] sm:$0xff]  ;;  %v54_v2 = vld [vmem:[%s462_s1 + $0xf8] sm:$0xff] }
   0x2   :  { %61 = vmatpush.msra.mxu0 %v53_v0  ;;  %81 = vmatpush.msra.mxu1 %v54_v2  ;;  %v52_v3 = vld [vmem:[%s462_s1 + $0xe8] sm:$0xff]  ;;  %v49_v4 = vld [vmem:[%s462_s1 + $0xd0] sm:$0xff]  ;;  %v50_v5 = vld [vmem:[%s462_s1 + $0xd8] sm:$0xff] }
   0x3   :  { %v47_v6 = vld [vmem:[%s462_s1 + $0xc0] sm:$0xff]  ;;  %v48_v7 = vld [vmem:[%s462_s1 + $0xc8] sm:$0xff]  ;;  %v45_v8 = vld [vmem:[%s462_s1 + $0xb0] sm:$0xff] }
   0x4   :  { %62 = vmatpush.msra.mxu0 %v51_v1  ;;  %82 = vmatpush.msra.mxu1 %v52_v3  ;;  %v46_v9 = vld [vmem:[%s462_s1 + $0xb8] sm:$0xff]  ;;  %v43_v10 = vld [vmem:[%s462_s1 + $0xa0] sm:$0xff]  ;;  %v44_v11 = vld [vmem:[%s462_s1 + $0xa8] sm:$0xff] }
   0x5   :  { %v41_v12 = vld [vmem:[%s462_s1 + $0x90] sm:$0xff]  ;;  %v42_v13 = vld [vmem:[%s462_s1 + $0x98] sm:$0xff]  ;;  %v39_v17 = vld [vmem:[%s462_s1 + $0x80] sm:$0xff] }
   0x6   :  { %63 = vmatpush.msra.mxu0 %v49_v4  ;;  %83 = vmatpush.msra.mxu1 %v50_v5  ;;  %v118_v14 = vld [vmem:[%s464_s3 + $0x78] sm:$0xff]  ;;  %v117_v15 = vld [vmem:[%s464_s3 + $0x70] sm:$0xff]  ;;  %v40_v18 = vld [vmem:[%s462_s1 + $0x88] sm:$0xff] }
   0x7   :  { %v134_v16 = vld [vmem:[%s464_s3 + $0xf8] sm:$0xff]  ;;  %137 = vmatpush.msra.mxu2 %v118_v14  ;;  %v133_v19 = vld [vmem:[%s464_s3 + $0xf0] sm:$0xff]  ;;  %v116_v20 = vld [vmem:[%s464_s3 + $0x68] sm:$0xff] }
   0x8   :  { %64 = vmatpush.msra.mxu0 %v47_v6  ;;  %84 = vmatpush.msra.mxu1 %v48_v7  ;;  %v132_v21 = vld [vmem:[%s464_s3 + $0xe8] sm:$0xff]  ;;  %v37_v22 = vld [vmem:[%s462_s1 + $0x70] sm:$0xff]  ;;  %v38_v23 = vld [vmem:[%s462_s1 + $0x78] sm:$0xff] }
   0x9   :  { %157 = vmatpush.msra.mxu3 %v134_v16  ;;  %138 = vmatpush.msra.mxu2 %v117_v15  ;;  %v115_v24 = vld [vmem:[%s464_s3 + $0x60] sm:$0xff]  ;;  %v36_v27 = vld [vmem:[%s462_s1 + $0x68] sm:$0xff]  ;;  %v114_v28 = vld [vmem:[%s464_s3 + $0x58] sm:$0xff] }
   0xa   :  { %65 = vmatpush.msra.mxu0 %v45_v8  ;;  %85 = vmatpush.msra.mxu1 %v46_v9  ;;  %v131_v25 = vld [vmem:[%s464_s3 + $0xe0] sm:$0xff]  ;;  %v130_v29 = vld [vmem:[%s464_s3 + $0xd8] sm:$0xff]  ;;  %v33_v30 = vld [vmem:[%s462_s1 + $0x50] sm:$0xff] }
   0xb   :  { %158 = vmatpush.msra.mxu3 %v133_v19  ;;  %v35_v26 = vld [vmem:[%s462_s1 + $0x60] sm:$0xff]  ;;  %139 = vmatpush.msra.mxu2 %v116_v20  ;;  %v34_v31 = vld [vmem:[%s462_s1 + $0x58] sm:$0xff] }
   0xc   :  { %66 = vmatpush.msra.mxu0 %v43_v10  ;;  %86 = vmatpush.msra.mxu1 %v44_v11 }
   0xd   :  { %159 = vmatpush.msra.mxu3 %v132_v21  ;;  %140 = vmatpush.msra.mxu2 %v115_v24 }
   0xe   :  { %67 = vmatpush.msra.mxu0 %v41_v12  ;;  %87 = vmatpush.msra.mxu1 %v42_v13 }
   0xf   :  { %160 = vmatpush.msra.mxu3 %v131_v25 }
  0x10   :  { %68 = vmatpush.msra.mxu0 %v39_v17  ;;  %88 = vmatpush.msra.mxu1 %v40_v18 }
  0x12   :  { %69 = vmatpush.msra.mxu0 %v37_v22  ;;  %89 = vmatpush.msra.mxu1 %v38_v23 }
  0x13   :  { %11 = vsyncpa [#allocation4], 0  ;;  %v113_v32 = vld [vmem:[%s464_s3 + $0x50] sm:$0xff]  ;;  %v31_v34 = vld [vmem:[%s462_s1 + $0x40] sm:$0xff]  ;;  %141 = vmatpush.msra.mxu2 %v114_v28  ;;  %161 = vmatpush.msra.mxu3 %v130_v29  ;;  %v136_v10 = vstv %s465_s4  ;;  %s186_s26 = sshll.u32 %s466_s5, 4  ;;  %vm177_vm0 = vcmask 57344   ;;  %s187_s26 = int_to_ptr.hbm [resolvable:$true] %s186_s26 }
  0x14   :  { %70 = vmatpush.msra.mxu0 %v35_v26  ;;  %90 = vmatpush.msra.mxu1 %v36_v27  ;;  %v129_v33 = vld [vmem:[%s464_s3 + $0xd0] sm:$0xff]  ;;  %v32_v35 = vld [vmem:[%s462_s1 + $0x48] sm:$0xff]  ;;  %v30_v39 = vld [vmem:[%s462_s1 + $0x38] sm:$0xff] }
  0x15   :  { %v112_v36 = vld [vmem:[%s464_s3 + $0x48] sm:$0xff]  ;;  %v29_v38 = vld [vmem:[%s462_s1 + $0x30] sm:$0xff]  ;;  %142 = vmatpush.msra.mxu2 %v113_v32  ;;  %162 = vmatpush.msra.mxu3 %v129_v33  ;;  %v111_v40 = vld [vmem:[%s464_s3 + $0x40] sm:$0xff] }
  0x16   :  { %71 = vmatpush.msra.mxu0 %v33_v30  ;;  %91 = vmatpush.msra.mxu1 %v34_v31  ;;  %v128_v37 = vld [vmem:[%s464_s3 + $0xc8] sm:$0xff]  ;;  %v127_v41 = vld [vmem:[%s464_s3 + $0xc0] sm:$0xff]  ;;  %v110_v44 = vld [vmem:[%s464_s3 + $0x38] sm:$0xff] }
  0x17   :  { %v27_v42 = vld [vmem:[%s462_s1 + $0x20] sm:$0xff]  ;;  %v28_v43 = vld [vmem:[%s462_s1 + $0x28] sm:$0xff]  ;;  %143 = vmatpush.msra.mxu2 %v112_v36  ;;  %163 = vmatpush.msra.mxu3 %v128_v37  ;;  %v126_v45 = vld [vmem:[%s464_s3 + $0xb8] sm:$0xff] }
  0x18   :  { %72 = vmatpush.msra.mxu0 %v31_v34  ;;  %92 = vmatpush.msra.mxu1 %v32_v35  ;;  %v25_v46 = vld [vmem:[%s462_s1 + $0x10] sm:$0xff]  ;;  %v26_v47 = vld [vmem:[%s462_s1 + $0x18] sm:$0xff]  ;;  %v23_v50 = vld [vmem:[%s462_s1] sm:$0xff] }
  0x19   :  { %144 = vmatpush.msra.mxu2 %v111_v40  ;;  %164 = vmatpush.msra.mxu3 %v127_v41  ;;  %v109_v48 = vld [vmem:[%s464_s3 + $0x30] sm:$0xff]  ;;  %v24_v51 = vld [vmem:[%s462_s1 + $0x8] sm:$0xff]  ;;  %v22_v52 = vld [vmem:[%s461_s0] sm:$0x1] }
  0x1a   :  { %73 = vmatpush.msra.mxu0 %v29_v38  ;;  %93 = vmatpush.msra.mxu1 %v30_v39  ;;  %v125_v49 = vld [vmem:[%s464_s3 + $0xb0] sm:$0xff]  ;;  %v108_v53 = vld [vmem:[%s464_s3 + $0x28] sm:$0xff]  ;;  %v107_v54 = vld [vmem:[%s464_s3 + $0x20] sm:$0xff] }
  0x1b   :  { %145 = vmatpush.msra.mxu2 %v110_v44  ;;  %165 = vmatpush.msra.mxu3 %v126_v45  ;;  %v124_v55 = vld [vmem:[%s464_s3 + $0xa8] sm:$0xff]  ;;  %v106_v56 = vld [vmem:[%s464_s3 + $0x18] sm:$0xff]  ;;  %v123_v57 = vld [vmem:[%s464_s3 + $0xa0] sm:$0xff] }
  0x1c   :  { %74 = vmatpush.msra.mxu0 %v27_v42  ;;  %94 = vmatpush.msra.mxu1 %v28_v43  ;;  %v105_v58 = vld [vmem:[%s464_s3 + $0x10] sm:$0xff]  ;;  %v122_v59 = vld [vmem:[%s464_s3 + $0x98] sm:$0xff]  ;;  %v104_v60 = vld [vmem:[%s464_s3 + $0x8] sm:$0xff] }
  0x1d   :  { %146 = vmatpush.msra.mxu2 %v109_v48  ;;  %166 = vmatpush.msra.mxu3 %v125_v49  ;;  %v121_v61 = vld [vmem:[%s464_s3 + $0x90] sm:$0xff]  ;;  %v103_v62 = vld [vmem:[%s464_s3] sm:$0xff]  ;;  %v120_v63 = vld [vmem:[%s464_s3 + $0x88] sm:$0xff] }
  0x1e   :  { %75 = vmatpush.msra.mxu0 %v25_v46  ;;  %95 = vmatpush.msra.mxu1 %v26_v47  ;;  %v119_v0 = vld [vmem:[%s464_s3 + $0x80] sm:$0xff]  ;;  %s226_s3 = smov [#allocation3]  }
  0x1f   :  { %147 = vmatpush.msra.mxu2 %v108_v53  ;;  %167 = vmatpush.msra.mxu3 %v124_v55  ;;  %v55_v1 = vld [vmem:[%s463_s2] sm:$0x3]  ;;  %s184_s25 = sshll.u32 %s226_s3, 4  ;;  %s185_s25 = int_to_ptr.vmem [resolvable:$true] %s184_s25 }
  0x20   :  { %76 = vmatpush.msra.mxu0 %v23_v50  ;;  %96 = vmatpush.msra.mxu1 %v24_v51  ;;  %v57_v2 = vperm.slane %v55_v1, 0  ;;  %v58_v3 = vperm.slane %v55_v1, 1 }
  0x21   :  { %77 = vmatmul.f32.vlgmr.msra.gmra.mxu0 %v22_v52  ;;  %97 = vmatmul.f32.vlgmr.msra.gmra.mxu1 %v22_v52 }
  0x22   :  { %148 = vmatpush.msra.mxu2 %v107_v54  ;;  %168 = vmatpush.msra.mxu3 %v123_v57 }
  0x24   :  { %149 = vmatpush.msra.mxu2 %v106_v56  ;;  %169 = vmatpush.msra.mxu3 %v122_v59 }
  0x26   :  { %150 = vmatpush.msra.mxu2 %v105_v58  ;;  %170 = vmatpush.msra.mxu3 %v121_v61 }
  0x28   :  { %151 = vmatpush.msra.mxu2 %v104_v60  ;;  %171 = vmatpush.msra.mxu3 %v120_v63 }
  0x2a   :  { %152 = vmatpush.msra.mxu2 %v103_v62  ;;  %172 = vmatpush.msra.mxu3 %v119_v0 }
  0x9e   :  { %v78_v4 = vpop.f32.mrf.mxu0  ;;  %v98_v5 = vpop.f32.mrf.mxu1 }
  0x9f   :  { %v79_v6 = vadd.f32 %v78_v4, %v57_v2  ;;  %v99_v7 = vadd.f32 %v98_v5, %v58_v3 }
  0xa1   :  { %196 = vtanh.f32 %v79_v6 }
  0xa2   :  { %198 = vtanh.f32 %v99_v7 }
  0xa7   :  { %v197_v8 = vpop.eup %196 }
  0xa8   :  { %v199_v9 = vpop.eup %198  ;;  %153 = vmatmul.f32.vlgmr.msra.gmra.mxu2 %v197_v8 }
  0xa9   :  { %173 = vmatmul.f32.vlgmr.msra.gmra.mxu3 %v199_v9 }
 0x12b   :  { %v154_v11 = vpop.f32.mrf.mxu2 }
 0x12c   :  { %v155_v12 = vadd.f32 %v154_v11, %v136_v10  ;;  %v174_v13 = vpop.f32.mrf.mxu3 }
 0x12e   :  { %v175_v14 = vadd.f32 %v174_v13, %v155_v12 }
 0x130   :  { %178 = vst.msk [vmem:[#allocation3] sm:$0x1] %vm177_vm0, %v175_v14 }
 0x131   :  { %189 = dma.vmem_to_hbm [thread:$0]  %s185_s25, 16, %s187_s26, [#allocation4]  }
 0x132   :  { %224 = dma.done.wait [#allocation4], 16  }
 0x133   :  { %225 = vsyncadd [#allocation4], 4294967280 }
 0x134   :  { %194 = vsyncpa [#allocation4], 1 }

</bundles_post_ra>
